<compile_context>
chip_gen: v7x
topology: tpu7x:2x2x1
jax: 0.10.0
libtpu: 0.0.40
codegen_flags: <defaults>
</compile_context>

<pallas_src>
import numpy as np
import jax
import jax.numpy as jnp
from jax.experimental import pallas as pl
from jax.experimental.pallas import tpu as pltpu


def _rect_sum_matrix(H, W):
    """(16, H*W) 0/1 matrix: row t = kh*4+kw = indicator of input positions hit by
    conv tap (kh, kw) summed over all valid output positions (k=4, pad=1, stride=1)."""
    OH, OW = H - 1, W - 1
    M = np.zeros((16, H * W), dtype=np.float32)
    for kh in range(4):
        r0, r1 = max(0, kh - 1), min(H, kh - 1 + OH)
        for kw in range(4):
            c0, c1 = max(0, kw - 1), min(W, kw - 1 + OW)
            blk = np.zeros((H, W), dtype=np.float32)
            blk[r0:r1, c0:c1] = 1.0
            M[kh * 4 + kw] = blk.reshape(H * W)
    return M


def task_head_pallas(x_nchw, w1, b1, w2, b2):
    """x_nchw: (N, C, H, W); w1: (1, C, 1, 1); b1: (1,); w2: (Cout, C, 4, 4); b2: (Cout,)."""
    N, C, H, W = x_nchw.shape
    Cout = w2.shape[0]
    OH, OW = H - 1, W - 1
    HW = H * W
    CHW = C * HW
    inv_area = 1.0 / float(OH * OW)

    # Free reshape of NCHW: all of (C, H, W) lands on the lane axis.
    x_flat = x_nchw.reshape(N, CHW).astype(jnp.float32)

    # Fuse rect-sum matrix + final_conv weights + spatial mean -> (Cout, C*HW).
    m_rect = jnp.asarray(_rect_sum_matrix(H, W))                       # (16, HW)
    w2_r = w2.reshape(Cout, C, 16).astype(jnp.float32)                 # tap t = kh*4 + kw
    kw_fused = (jnp.einsum('th,oct->och', m_rect, w2_r) * inv_area).reshape(Cout, CHW)
    # TODO(synk): on v6e/v7x the gated activations + kw_fused could be cast to bf16
    # (f32 accumulation) to halve MXU/DMA bytes; kept f32 to hold tight tolerance
    # and because v5e has no bf16 VPU path.

    w1_k = w1.reshape(C).astype(jnp.float32)         # (C,)      -> SMEM scalars
    b1_k = b1.reshape(1).astype(jnp.float32)         # (1,)      -> SMEM scalar
    b2_k = b2.reshape(1, Cout).astype(jnp.float32)   # (1, Cout) -> VMEM broadcast-add

    # Batch tiling: Nb samples per grid step.
    if N <= 8:
        Nb, N_pad = N, N
    else:
        Nb = 256 if N >= 256 else 8
        N_pad = -(-N // Nb) * Nb
        if N_pad != N:
            x_flat = jnp.pad(x_flat, ((0, N_pad - N), (0, 0)))
    grid = (N_pad // Nb,)

    def kernel(w1_ref, b1_ref, x_ref, k_ref, b2_ref, o_ref):
        xv = x_ref[...]                                               # (Nb, C*HW) f32
        # SpatialAttention: 1x1 conv over channels (aligned 256-lane slices, VPU)
        # + sigmoid (EUP) -> lane-dense (Nb, HW) gate.
        logits = w1_ref[0] * xv[:, 0:HW]
        for c in range(1, C):
            logits = logits + w1_ref[c] * xv[:, c * HW:(c + 1) * HW]
        gate = jax.nn.sigmoid(logits + b1_ref[0])                     # (Nb, HW)
        # Gated per-channel slabs contracted on the MXU against the fused
        # conv/mean matrix (RHS transposed: contract last dims of both), f32 acc.
        dims = (((1,), (1,)), ((), ()))
        acc = jax.lax.dot_general(xv[:, 0:HW] * gate, k_ref[:, 0:HW],
                                  dimension_numbers=dims,
                                  preferred_element_type=jnp.float32)  # (Nb, Cout)
        for c in range(1, C):
            acc = acc + jax.lax.dot_general(
                xv[:, c * HW:(c + 1) * HW] * gate,
                k_ref[:, c * HW:(c + 1) * HW],
                dimension_numbers=dims,
                preferred_element_type=jnp.float32)
        # final_conv bias is constant over spatial, so it commutes with the mean.
        o_ref[...] = acc + b2_ref[...]

    out = pl.pallas_call(
        kernel,
        out_shape=jax.ShapeDtypeStruct((N_pad, Cout), jnp.float32),
        grid=grid,
        in_specs=[
            pl.BlockSpec(memory_space=pltpu.MemorySpace.SMEM),        # w1 (C,)
            pl.BlockSpec(memory_space=pltpu.MemorySpace.SMEM),        # b1 (1,)
            pl.BlockSpec((Nb, CHW), lambda n: (n, 0)),                # x block
            pl.BlockSpec((Cout, CHW), lambda n: (0, 0)),              # fused weights
            pl.BlockSpec((1, Cout), lambda n: (0, 0)),                # b2
        ],
        out_specs=pl.BlockSpec((Nb, Cout), lambda n: (n, 0)),
        compiler_params=pltpu.CompilerParams(
            dimension_semantics=("parallel",)),
    )(w1_k, b1_k, x_flat, kw_fused, b2_k)

    return out[:N]


def task_head_reference(x_nchw, w1, b1, w2, b2):
    """Pure-JAX reference mirroring the PyTorch forward (NCHW)."""
    logits = jnp.einsum('nchw,c->nhw', x_nchw, w1[0, :, 0, 0]) + b1[0]
    mask = jax.nn.sigmoid(logits)[:, None, :, :]
    a = x_nchw * mask
    out = jax.lax.conv_general_dilated(
        a, w2, window_strides=(1, 1), padding=((1, 1), (1, 1)),
        dimension_numbers=('NCHW', 'OIHW', 'NCHW'))
    out = out + b2[None, :, None, None]
    return out.mean(axis=(2, 3))


if __name__ == "__main__":
    N, C_in, C_out, H, W = 2, 4, 3, 16, 16
    key = jax.random.PRNGKey(0)
    k1, k2, k3, k4, k5 = jax.random.split(key, 5)
    x = jax.random.normal(k1, (N, C_in, H, W), jnp.float32)
    w1 = jax.random.normal(k2, (1, C_in, 1, 1), jnp.float32) * 0.1       # conv_mask.weight
    b1 = jax.random.normal(k3, (1,), jnp.float32) * 0.1                  # conv_mask.bias
    w2 = jax.random.normal(k4, (C_out, C_in, 4, 4), jnp.float32) * 0.05  # final_conv.weight
    b2 = jax.random.normal(k5, (C_out,), jnp.float32) * 0.05             # final_conv.bias

    y = task_head_pallas(x, w1, b1, w2, b2)
    y = jax.block_until_ready(y)

    y_ref = task_head_reference(x, w1, b1, w2, b2)
    assert y.shape == (N, C_out), y.shape
    assert jnp.allclose(y, y_ref, rtol=1e-3, atol=1e-4), (y, y_ref)

    print("KERNEL_OK")
</pallas_src>

<mosaic_0001>
module attributes {stable_mosaic.version = 11 : i64} {
  func.func @kernel(%arg0: i32, %arg1: memref<4xf32, #tpu.memory_space<smem>>, %arg2: memref<1xf32, #tpu.memory_space<smem>>, %arg3: memref<2x1024xf32, #tpu.memory_space<vmem>>, %arg4: memref<3x1024xf32, #tpu.memory_space<vmem>>, %arg5: memref<1x3xf32, #tpu.memory_space<vmem>>, %arg6: memref<2x3xf32, #tpu.memory_space<vmem>>) attributes {dimension_semantics = [#tpu.dimension_semantics<parallel>], iteration_bounds = array<i64: 1>, scalar_prefetch = 0 : i64, scratch_operands = 0 : i64, tpu.core_type = #tpu.core_type<tc>, window_params = [{transform_indices = @transform_0, window_bounds = array<i64: 4>}, {transform_indices = @transform_1, window_bounds = array<i64: 1>}, {transform_indices = @transform_2, window_bounds = array<i64: 2, 1024>}, {pipeline_mode = #tpu.pipeline_mode<synchronous>, transform_indices = @transform_3, window_bounds = array<i64: 3, 1024>}, {pipeline_mode = #tpu.pipeline_mode<synchronous>, transform_indices = @transform_4, window_bounds = array<i64: 1, 3>}, {transform_indices = @transform_5, window_bounds = array<i64: 2, 3>}]} {
    %c0 = arith.constant 0 : index
    %c0_0 = arith.constant 0 : index
    %0 = vector.load %arg3[%c0, %c0_0] : memref<2x1024xf32, #tpu.memory_space<vmem>>, vector<2x1024xf32>
    %c0_1 = arith.constant 0 : index
    %1 = memref.load %arg1[%c0_1] : memref<4xf32, #tpu.memory_space<smem>>
    %2 = vector.extract_strided_slice %0 {offsets = [0, 0], sizes = [2, 256], strides = [1, 1]} : vector<2x1024xf32> to vector<2x256xf32>
    %3 = vector.broadcast %1 : f32 to vector<2x256xf32>
    %4 = arith.mulf %3, %2 : vector<2x256xf32>
    %c1 = arith.constant 1 : index
    %5 = memref.load %arg1[%c1] : memref<4xf32, #tpu.memory_space<smem>>
    %6 = vector.extract_strided_slice %0 {offsets = [0, 256], sizes = [2, 256], strides = [1, 1]} : vector<2x1024xf32> to vector<2x256xf32>
    %7 = vector.broadcast %5 : f32 to vector<2x256xf32>
    %8 = arith.mulf %7, %6 : vector<2x256xf32>
    %9 = arith.addf %4, %8 : vector<2x256xf32>
    %c2 = arith.constant 2 : index
    %10 = memref.load %arg1[%c2] : memref<4xf32, #tpu.memory_space<smem>>
    %11 = vector.extract_strided_slice %0 {offsets = [0, 512], sizes = [2, 256], strides = [1, 1]} : vector<2x1024xf32> to vector<2x256xf32>
    %12 = vector.broadcast %10 : f32 to vector<2x256xf32>
    %13 = arith.mulf %12, %11 : vector<2x256xf32>
    %14 = arith.addf %9, %13 : vector<2x256xf32>
    %c3 = arith.constant 3 : index
    %15 = memref.load %arg1[%c3] : memref<4xf32, #tpu.memory_space<smem>>
    %16 = vector.extract_strided_slice %0 {offsets = [0, 768], sizes = [2, 256], strides = [1, 1]} : vector<2x1024xf32> to vector<2x256xf32>
    %17 = vector.broadcast %15 : f32 to vector<2x256xf32>
    %18 = arith.mulf %17, %16 : vector<2x256xf32>
    %19 = arith.addf %14, %18 : vector<2x256xf32>
    %c0_2 = arith.constant 0 : index
    %20 = memref.load %arg2[%c0_2] : memref<1xf32, #tpu.memory_space<smem>>
    %21 = vector.broadcast %20 : f32 to vector<2x256xf32>
    %22 = arith.addf %19, %21 : vector<2x256xf32>
    %23 = arith.negf %22 : vector<2x256xf32>
    %24 = math.exp %23 : vector<2x256xf32>
    %cst = arith.constant 1.000000e+00 : f32
    %25 = vector.broadcast %cst : f32 to vector<2x256xf32>
    %26 = arith.addf %25, %24 : vector<2x256xf32>
    %27 = arith.divf %25, %26 : vector<2x256xf32>
    %28 = vector.extract_strided_slice %0 {offsets = [0, 0], sizes = [2, 256], strides = [1, 1]} : vector<2x1024xf32> to vector<2x256xf32>
    %29 = arith.mulf %28, %27 : vector<2x256xf32>
    %c0_3 = arith.constant 0 : index
    %c0_4 = arith.constant 0 : index
    %30 = vector.load %arg4[%c0_3, %c0_4] : memref<3x1024xf32, #tpu.memory_space<vmem>>, vector<3x256xf32>
    %cst_5 = arith.constant dense<0.000000e+00> : vector<2x3xf32>
    %31 = tpu.matmul %29, %30, %cst_5 {dimension_numbers = #tpu.dot_dimension_numbers<[1], [1], [0], [0], [0, 0, 1, 0], [], []>} : vector<2x256xf32>, vector<3x256xf32>, vector<2x3xf32> -> vector<2x3xf32>
    %32 = vector.extract_strided_slice %0 {offsets = [0, 256], sizes = [2, 256], strides = [1, 1]} : vector<2x1024xf32> to vector<2x256xf32>
    %33 = arith.mulf %32, %27 : vector<2x256xf32>
    %c0_6 = arith.constant 0 : index
    %c256 = arith.constant 256 : index
    %34 = vector.load %arg4[%c0_6, %c256] : memref<3x1024xf32, #tpu.memory_space<vmem>>, vector<3x256xf32>
    %cst_7 = arith.constant dense<0.000000e+00> : vector<2x3xf32>
    %35 = tpu.matmul %33, %34, %cst_7 {dimension_numbers = #tpu.dot_dimension_numbers<[1], [1], [0], [0], [0, 0, 1, 0], [], []>} : vector<2x256xf32>, vector<3x256xf32>, vector<2x3xf32> -> vector<2x3xf32>
    %36 = arith.addf %31, %35 : vector<2x3xf32>
    %37 = vector.extract_strided_slice %0 {offsets = [0, 512], sizes = [2, 256], strides = [1, 1]} : vector<2x1024xf32> to vector<2x256xf32>
    %38 = arith.mulf %37, %27 : vector<2x256xf32>
    %c0_8 = arith.constant 0 : index
    %c512 = arith.constant 512 : index
    %39 = vector.load %arg4[%c0_8, %c512] : memref<3x1024xf32, #tpu.memory_space<vmem>>, vector<3x256xf32>
    %cst_9 = arith.constant dense<0.000000e+00> : vector<2x3xf32>
    %40 = tpu.matmul %38, %39, %cst_9 {dimension_numbers = #tpu.dot_dimension_numbers<[1], [1], [0], [0], [0, 0, 1, 0], [], []>} : vector<2x256xf32>, vector<3x256xf32>, vector<2x3xf32> -> vector<2x3xf32>
    %41 = arith.addf %36, %40 : vector<2x3xf32>
    %42 = vector.extract_strided_slice %0 {offsets = [0, 768], sizes = [2, 256], strides = [1, 1]} : vector<2x1024xf32> to vector<2x256xf32>
    %43 = arith.mulf %42, %27 : vector<2x256xf32>
    %c0_10 = arith.constant 0 : index
    %c768 = arith.constant 768 : index
    %44 = vector.load %arg4[%c0_10, %c768] : memref<3x1024xf32, #tpu.memory_space<vmem>>, vector<3x256xf32>
    %cst_11 = arith.constant dense<0.000000e+00> : vector<2x3xf32>
    %45 = tpu.matmul %43, %44, %cst_11 {dimension_numbers = #tpu.dot_dimension_numbers<[1], [1], [0], [0], [0, 0, 1, 0], [], []>} : vector<2x256xf32>, vector<3x256xf32>, vector<2x3xf32> -> vector<2x3xf32>
    %46 = arith.addf %41, %45 : vector<2x3xf32>
    %c0_12 = arith.constant 0 : index
    %c0_13 = arith.constant 0 : index
    %47 = vector.load %arg5[%c0_12, %c0_13] : memref<1x3xf32, #tpu.memory_space<vmem>>, vector<1x3xf32>
    %48 = vector.broadcast %47 : vector<1x3xf32> to vector<2x3xf32>
    %49 = arith.addf %46, %48 : vector<2x3xf32>
    %c0_14 = arith.constant 0 : index
    %c0_15 = arith.constant 0 : index
    %50 = vector.load %arg6[%c0_14, %c0_15] : memref<2x3xf32, #tpu.memory_space<vmem>>, vector<2x3xf32>
    tpu.vector_store %arg6[%c0_14, %c0_15], %49 {strides = array<i32>} : memref<2x3xf32, #tpu.memory_space<vmem>>, vector<2x3xf32>,
    return
  }
  func.func @transform_0(%arg0: i32) -> i32 {
    %c0_i32 = arith.constant 0 : i32
    %c0_i32_0 = arith.constant 0 : i32
    return %c0_i32 : i32
  }
  func.func @transform_1(%arg0: i32) -> i32 {
    %c0_i32 = arith.constant 0 : i32
    %c0_i32_0 = arith.constant 0 : i32
    return %c0_i32 : i32
  }
  func.func @transform_2(%arg0: i32) -> (i32, i32) {
    %c0_i32 = arith.constant 0 : i32
    %c0_i32_0 = arith.constant 0 : i32
    return %arg0, %c0_i32 : i32, i32
  }
  func.func @transform_3(%arg0: i32) -> (i32, i32) {
    %c0_i32 = arith.constant 0 : i32
    %c0_i32_0 = arith.constant 0 : i32
    %c0_i32_1 = arith.constant 0 : i32
    return %c0_i32, %c0_i32_0 : i32, i32
  }
  func.func @transform_4(%arg0: i32) -> (i32, i32) {
    %c0_i32 = arith.constant 0 : i32
    %c0_i32_0 = arith.constant 0 : i32
    %c0_i32_1 = arith.constant 0 : i32
    return %c0_i32, %c0_i32_0 : i32, i32
  }
  func.func @transform_5(%arg0: i32) -> (i32, i32) {
    %c0_i32 = arith.constant 0 : i32
    %c0_i32_0 = arith.constant 0 : i32
    return %arg0, %c0_i32 : i32, i32
  }
}

</mosaic_0001>

<bundles_post_ra>
// kernel: tpu_custom_call.1
= control target key start
LH: loop header
LB: loop body
LE: loop exit
PB: predicated region body
PF: predicated region fallthrough
CT: control target
= control target key end

     0   :  { %11 = vsyncpa [#allocation6], 0  ;;  %s648_s0 = inlined_call_operand.vmem [shape: f32[4], index: 0, kind: input, shape index: {}]   ;;  %s649_s1 = inlined_call_operand.<no memory space> [shape: f32[1], index: 1, kind: input, shape index: {}]   ;;  %s650_s2 = inlined_call_operand.hbm [shape: f32[2,1024], index: 2, kind: input, shape index: {}]   ;;  %s651_s3 = inlined_call_operand.hbm [shape: f32[3,1024], index: 3, kind: input, shape index: {}]   ;;  %s652_s4 = inlined_call_operand.vmem [shape: f32[1,3], index: 4, kind: input, shape index: {}]   ;;  %s653_s5 = inlined_call_operand.hbm [shape: f32[2,3], index: 5, kind: output, shape index: {}]  }
   0x1   :  { %12 = vsyncpa [#allocation4], 0 }
   0x2   :  { %13 = vsyncpa [#allocation9], 0 }
   0x3   :  { %14 = vsyncpa [#allocation5], 0  ;;  %s21_s20 = sshll.u32 %s648_s0, 4  ;;  %s22_s20 = int_to_ptr.vmem [resolvable:$true] %s21_s20 }
   0x4   :  { %s482_s21 = scalar_lea.vmem %s22_s20, 16  ;;  %p487_p1 = scmp.lt.s32.totalorder %s22_s20, %s22_s20 }
   0x5   :  { %p483_p0 = scmp.ne.s32.totalorder %s22_s20, %s482_s21  ;;  %p488_p2 = scmp.lt.s32.totalorder %s482_s21, %s482_s21 }
   0x7   :  { %p489_p3 = por %p488_p2, %p487_p1 }
   0x9   :  { %p490_p4 = pnand %p489_p3, %p483_p0 }
   0xb   :  { %493 = shalt.err (!%p490_p4)
}
   0xc   :  { %s568_s22 = smov [#allocation3]   ;;  %s569_s23 = smov [#allocation7]  }
   0xd   :  { %24 = dma.vmem_to_smem %s22_s20, 16, %s568_s22, [#allocation6]  }
   0xe   :  { %s33_s24 = sshll.u32 %s569_s23, 4  ;;  %s570_s25 = smov [#allocation8]   ;;  %s34_s24 = int_to_ptr.vmem [resolvable:$true] %s33_s24 }
   0xf   :  { %s43_s26 = sshll.u32 %s570_s25, 4  ;;  %s494_s29 = scalar_lea.hbm %s650_s2, 256  ;;  %s44_s26 = int_to_ptr.vmem [resolvable:$true] %s43_s26 }
  0x10   :  { %p495_p5 = scmp.ne.s32.totalorder %s650_s2, %s494_s29  ;;  %p498_p6 = scmp.lt.u32.totalorder %s494_s29, %s650_s2 }
  0x12   :  { %p500_p7 = pnand %p498_p6, %p495_p5 }
  0x14   :  { %503 = shalt.err (!%p500_p7)
}
  0x15   :  { %s504_s8 = scalar_lea.vmem %s34_s24, 256  ;;  %p509_p9 = scmp.lt.s32.totalorder %s34_s24, %s34_s24 }
  0x16   :  { %p505_p8 = scmp.ne.s32.totalorder %s34_s24, %s504_s8  ;;  %p510_p10 = scmp.lt.s32.totalorder %s504_s8, %s504_s8 }
  0x18   :  { %p511_p11 = por %p510_p10, %p509_p9 }
  0x1a   :  { %p512_p12 = pnand %p511_p11, %p505_p8 }
  0x1c   :  { %515 = shalt.err (!%p512_p12)
}
  0x1d   :  { %36 = dma.hbm_to_vmem [thread:$0]  %s650_s2, 256, %s34_s24, [#allocation4]  }
  0x1e   :  { %s516_s13 = scalar_lea.hbm %s651_s3, 512 }
  0x1f   :  { %p517_p13 = scmp.ne.s32.totalorder %s651_s3, %s516_s13  ;;  %p520_p0 = scmp.lt.u32.totalorder %s516_s13, %s651_s3 }
  0x21   :  { %p522_p1 = pnand %p520_p0, %p517_p13 }
  0x23   :  { %525 = shalt.err (!%p522_p1)
}
  0x24   :  { %s526_s18 = scalar_lea.vmem %s44_s26, 512  ;;  %p531_p3 = scmp.lt.s32.totalorder %s44_s26, %s44_s26 }
  0x25   :  { %p527_p2 = scmp.ne.s32.totalorder %s44_s26, %s526_s18  ;;  %p532_p4 = scmp.lt.s32.totalorder %s526_s18, %s526_s18 }
  0x27   :  { %p533_p5 = por %p532_p4, %p531_p3 }
  0x29   :  { %p534_p6 = pnand %p533_p5, %p527_p2 }
  0x2b   :  { %537 = shalt.err (!%p534_p6)
}
  0x2c   :  { %46 = dma.hbm_to_vmem [thread:$0]  %s651_s3, 512, %s44_s26, [#allocation9]  }
  0x2d   :  { %560 = dma.done.wait [#allocation6], 16  }
  0x2e   :  { %561 = vsyncadd [#allocation6], 4294967280 }
  0x2f   :  { %562 = dma.done.wait [#allocation4], 256  }
  0x30   :  { %563 = vsyncadd [#allocation4], 4294967040 }
  0x31   :  { %564 = dma.done.wait [#allocation9], 512  }
  0x32   :  { %565 = vsyncadd [#allocation9], 4294966784 }
  0x33   :  { %58 = sfence }
  0x34   :  { %v94_v0 = vld [vmem:[#allocation8 + $0x8] sm:$0x77]  ;;  %v92_v1 = vld [vmem:[#allocation8] sm:$0x77]  ;;  %v59_v4 = vld [vmem:[#allocation7] sm:$0xff]  ;;  %s61_s20 = sld [smem:[#allocation3]]  ;;  %v83_v22 = vstv %s649_s1  ;;  %v99_v30 = vlaneseq }
  0x35   :  { %v107_v2 = vcombine.high %v94_v0, %v94_v0  ;;  %v191_v3 = vcombine.high %v92_v1, %v92_v1  ;;  %s464_s21 = sld [smem:[#allocation3 + $0x1]]  ;;  %s465_s22 = sld [smem:[#allocation3 + $0x2]]  ;;  %v60_v5 = vld [vmem:[#allocation7 + $0x8] sm:$0xff]  ;;  %v264_v6 = vld [vmem:[#allocation8 + $0x10] sm:$0x77]  ;;  %v67_v8 = vrot.slane %v59_v4, 4 }
  0x36   :  { %s466_s23 = sld [smem:[#allocation3 + $0x3]]  ;;  %v351_v7 = vld [vmem:[#allocation8 + $0x18] sm:$0x77]  ;;  %v277_v9 = vcombine.high %v264_v6, %v264_v6  ;;  %v78_v11 = vrot.slane %v60_v5, 4  ;;  %v571_v28 = vmov 1983009808  }
  0x37   :  { %109 = vmatprep.subr.mxu0 %v107_v2  ;;  %193 = vmatprep.subr.mxu1 %v191_v3  ;;  %v364_v10 = vcombine.high %v351_v7, %v351_v7  ;;  %v97_v29 = vunpack.c.l.s4 %v571_v28  ;;  %v100_v32 = vshrl.u32 %v99_v30, 7  ;;  %v468_v57 = vld [vmem:[%s652_s4] ss:$0 sm:$0xff]  ;;  %s572_s26 = smov [#allocation10]   ;;  %vm445_vm0 = vcmask 17408  }
  0x38   :  { %110 = vmatpush1.xpose.msra.mxu0 %v94_v0  ;;  %194 = vmatpush1.xpose.msra.mxu1 %v92_v1  ;;  %s453_s27 = sshll.u32 %s572_s26, 4  ;;  %s454_s27 = int_to_ptr.vmem [resolvable:$true] %s453_s27 }
  0x39   :  { %279 = vmatprep.subr.mxu0 %v277_v9  ;;  %366 = vmatprep.subr.mxu1 %v364_v10  ;;  %v98_v31 = vunpack.c.0.s8 %v97_v29  ;;  %s538_s28 = scalar_lea.vmem %s454_s27, 32  ;;  %p543_p8 = scmp.lt.s32.totalorder %s454_s27, %s454_s27 }
  0x3a   :  { %v62_v12 = vstv %s61_s20  ;;  %p539_p7 = scmp.ne.s32.totalorder %s454_s27, %s538_s28  ;;  %p544_p9 = scmp.lt.s32.totalorder %s538_s28, %s538_s28 }
  0x3b   :  { %v65_v13 = vstv %s464_s21  ;;  %v63_v14 = vmul.f32 %v62_v12, %v59_v4  ;;  %v72_v16 = vstv %s465_s22  ;;  %v101_v33 = vsub.s32 %v98_v31, %v100_v32 }
  0x3c   :  { %v69_v15 = vmul.f32 %v67_v8, %v65_v13  ;;  %v76_v17 = vstv %s466_s23  ;;  %v73_v18 = vmul.f32 %v72_v16, %v60_v5  ;;  %p545_p10 = por %p544_p9, %p543_p8 }
  0x3d   :  { %v80_v20 = vmul.f32 %v78_v11, %v76_v17 }
  0x3e   :  { %v70_v19 = vadd.f32 %v69_v15, %v63_v14  ;;  %p546_p11 = pnand %p545_p10, %p539_p7 }
  0x40   :  { %v74_v21 = vadd.f32 %v73_v18, %v70_v19 }
  0x42   :  { %v81_v23 = vadd.f32 %v80_v20, %v74_v21 }
  0x44   :  { %v84_v24 = vadd.f32 %v83_v22, %v81_v23 }
  0x46   :  { %v467_v25 = vmul.f32 -1.442695, %v84_v24 }
  0x48   :  { %478 = vpow2.f32 %v467_v25 }
  0x52   :  { %v479_v26 = vpop.eup %478 }
  0x53   :  { %v88_v27 = vadd.f32 1.0, %v479_v26 }
  0x55   :  { %480 = vrcp.f32 %v88_v27 }
  0x5f   :  { %v481_v34 = vpop.eup %480 }
  0x60   :  { %v93_v35 = vmul.f32 %v481_v34, %v67_v8  ;;  %v91_v36 = vmul.f32 %v481_v34, %v59_v4  ;;  %v263_v37 = vmul.f32 %v481_v34, %v60_v5  ;;  %v350_v38 = vmul.f32 %v481_v34, %v78_v11 }
  0x62   :  { %v102_v39 = vrot.slane %v93_v35, %v101_v33  ;;  %v186_v40 = vrot.slane %v91_v36, %v101_v33  ;;  %v272_v41 = vrot.slane %v263_v37, %v101_v33  ;;  %v359_v42 = vrot.slane %v350_v38, %v101_v33 }
  0x64   :  { %v103_v43 = vcombine.high %v102_v39, %v102_v39  ;;  %v187_v44 = vcombine.high %v186_v40, %v186_v40  ;;  %v273_v45 = vcombine.high %v272_v41, %v272_v41  ;;  %v360_v46 = vcombine.high %v359_v42, %v359_v42 }
  0x66   :  { %173 = vmatprep.mubr.f32.mxu0 %v103_v43  ;;  %257 = vmatprep.mubr.f32.mxu1 %v187_v44 }
  0x67   :  { %174 = vmatmul.mubr.f32.vlgmr.msra.gmra.mrb[0].mxu0 %v102_v39  ;;  %258 = vmatmul.mubr.f32.vlgmr.msra.gmra.mrb[0].mxu1 %v186_v40 }
  0x68   :  { %280 = vmatpush1.xpose.msra.mxu0 %v264_v6  ;;  %367 = vmatpush1.xpose.msra.mxu1 %v351_v7 }
  0x69   :  { %343 = vmatprep.mubr.f32.mxu0 %v273_v45  ;;  %430 = vmatprep.mubr.f32.mxu1 %v360_v46 }
  0x6b   :  { %344 = vmatmul.mubr.f32.vlgmr.msra.gmra.mrb[2].mxu0 %v272_v41  ;;  %431 = vmatmul.mubr.f32.vlgmr.msra.gmra.mrb[2].mxu1 %v359_v42 }
 0x13a   :  { %v175_v47 = vpop.f32.mrb[0].mxu0  ;;  %v259_v48 = vpop.f32.mrb[0].mxu1 }
 0x13b   :  { %v260_v49 = vadd.f32 %v259_v48, %v175_v47  ;;  %v177_v50 = vpop.f32.mrb[1].mxu0  ;;  %v261_v51 = vpop.f32.mrb[1].mxu1 }
 0x13e   :  { %v345_v52 = vpop.f32.mrb[2].mxu0  ;;  %v432_v53 = vpop.f32.mrb[2].mxu1 }
 0x13f   :  { %v349_v54 = vadd.f32 %v345_v52, %v260_v49  ;;  %v347_v55 = vpop.f32.mrb[3].mxu0  ;;  %v434_v56 = vpop.f32.mrb[3].mxu1 }
 0x141   :  { %v436_v58 = vadd.f32 %v432_v53, %v349_v54 }
 0x143   :  { %v444_v59 = vadd.f32 %v468_v57, %v436_v58 }
 0x145   :  { %446 = vst.msk [vmem:[#allocation10] sm:$0x3] %vm445_vm0, %v444_v59 }
 0x146   :  { %549 = shalt.err (!%p546_p11)
}
 0x147   :  { %s550_s30 = scalar_lea.hbm %s653_s5, 32 }
 0x148   :  { %p551_p12 = scmp.ne.s32.totalorder %s653_s5, %s550_s30  ;;  %p554_p13 = scmp.lt.u32.totalorder %s550_s30, %s653_s5 }
 0x14a   :  { %p556_p0 = pnand %p554_p13, %p551_p12 }
 0x14c   :  { %559 = shalt.err (!%p556_p0)
}
 0x14d   :  { %456 = dma.vmem_to_hbm [thread:$0]  %s454_s27, 32, %s653_s5, [#allocation5]  }
 0x14e   :  { %566 = dma.done.wait [#allocation5], 32  }
 0x14f   :  { %567 = vsyncadd [#allocation5], 4294967264 }
 0x150   :  { %460 = vsyncpa [#allocation4], 1 }
 0x151   :  { %461 = vsyncpa [#allocation9], 1 }
 0x152   :  { %462 = vsyncpa [#allocation5], 1 }
 0x153   :  { %463 = vsyncpa [#allocation6], 1 }

</bundles_post_ra>
